<compile_context>
chip_gen: v5e
topology: v5e:2x2
jax: 0.10.0
libtpu: 0.0.40
codegen_flags: <defaults>
</compile_context>

<pallas_src>
import functools
import math

import jax
import jax.numpy as jnp
from jax.experimental import pallas as pl
from jax.experimental.pallas import tpu as pltpu


@functools.lru_cache(maxsize=None)
def _vmem_limit():
    """~75% of physical VMEM (96 MiB v5e/v6e, 48 MiB v7x); capped at 112 MiB."""
    cap = 64 * 1024 * 1024
    try:
        q = int(pltpu.get_tpu_info().vmem_capacity_bytes)
        if q > 0:
            cap = q
    except Exception:
        pass
    return min((cap * 3) // 4, 112 * 1024 * 1024)


def _pick(dim, pref):
    """Largest tile <= pref that divides dim, preferring 256- then 128- then
    8-aligned sizes (MXU / lane friendly). Full extent only for small dims."""
    if dim <= pref:
        return dim
    for step in (256, 128, 8, 1):
        c = (pref // step) * step
        while c >= step:
            if dim % c == 0:
                return c
            c -= step
    return dim


def _full_spec(shape):
    """Whole-array block for a single-program grid=(1,)."""
    nd = len(shape)
    return pl.BlockSpec(shape, lambda i, _nd=nd: (0,) * _nd)


# ---------------------------------------------------------------------------
# Tiled matmul + bias (+ optional activation) kernel
# ---------------------------------------------------------------------------
def _matmul_bias_act_kernel(x_ref, w_ref, b_ref, o_ref, acc_ref, *, activation):
    k = pl.program_id(2)

    @pl.when(k == 0)
    def _():
        acc_ref[...] = jnp.zeros_like(acc_ref)

    acc_ref[...] += jnp.dot(x_ref[...], w_ref[...],
                            preferred_element_type=jnp.float32)

    @pl.when(k == pl.num_programs(2) - 1)
    def _():
        y = acc_ref[...] + b_ref[...].astype(jnp.float32)   # f32 epilogue
        if activation == "gelu":
            # TODO(synk): HF BERT uses exact (erf) GELU; tanh approximation here.
            y = jax.nn.gelu(y, approximate=True)
        elif activation == "tanh":
            y = jnp.tanh(y)
        o_ref[...] = y.astype(o_ref.dtype)


def linear(x, w, b, activation=None, out_dtype=jnp.bfloat16):
    """y = act(x @ w + b). x:(M,K) bf16, w:(K,N) bf16, b:(1,N) f32."""
    m, kdim = x.shape
    _, n = w.shape
    tm, tn, tk = _pick(m, 512), _pick(n, 512), _pick(kdim, 1024)
    grid = (m // tm, n // tn, kdim // tk)
    cost = pl.CostEstimate(
        flops=2 * m * n * kdim,
        transcendentals=(m * n if activation in ("gelu", "tanh") else 0),
        bytes_accessed=int(m * kdim * 2 + kdim * n * 2 + m * n * 2 + n * 4),
    )
    return pl.pallas_call(
        functools.partial(_matmul_bias_act_kernel, activation=activation),
        grid=grid,
        in_specs=[
            pl.BlockSpec((tm, tk), lambda i, j, k: (i, k)),
            pl.BlockSpec((tk, tn), lambda i, j, k: (k, j)),
            pl.BlockSpec((1, tn), lambda i, j, k: (0, j)),
        ],
        out_specs=pl.BlockSpec((tm, tn), lambda i, j, k: (i, j)),
        out_shape=jax.ShapeDtypeStruct((m, n), out_dtype),
        scratch_shapes=[pltpu.VMEM((tm, tn), jnp.float32)],
        compiler_params=pltpu.CompilerParams(
            dimension_semantics=("parallel", "parallel", "arbitrary"),
            vmem_limit_bytes=_vmem_limit()),
        cost_estimate=cost,
    )(x, w, b)


# ---------------------------------------------------------------------------
# Tiled matmul + bias + residual-add + LayerNorm fused kernel
# (N = hidden kept whole per tile so the LN reduction stays in-kernel.)
# ---------------------------------------------------------------------------
def _matmul_res_ln_kernel(x_ref, w_ref, b_ref, res_ref, g_ref, bl_ref,
                          o_ref, acc_ref):
    k = pl.program_id(1)

    @pl.when(k == 0)
    def _():
        acc_ref[...] = jnp.zeros_like(acc_ref)

    acc_ref[...] += jnp.dot(x_ref[...], w_ref[...],
                            preferred_element_type=jnp.float32)

    @pl.when(k == pl.num_programs(1) - 1)
    def _():
        z = (acc_ref[...] + b_ref[...].astype(jnp.float32)
             + res_ref[...].astype(jnp.float32))
        mu = jnp.mean(z, axis=-1, keepdims=True)
        var = jnp.mean((z - mu) ** 2, axis=-1, keepdims=True)
        z = (z - mu) * jax.lax.rsqrt(var + 1e-12)
        o_ref[...] = (z * g_ref[...] + bl_ref[...]).astype(o_ref.dtype)


def linear_residual_layernorm(x, w, b, res, gamma, beta, out_dtype=jnp.bfloat16):
    """LayerNorm(res + x @ w + b). x:(M,K), w:(K,H), res:(M,H)."""
    m, kdim = x.shape
    _, n = w.shape
    tm, tk = _pick(m, 512), _pick(kdim, 1024)
    grid = (m // tm, kdim // tk)
    cost = pl.CostEstimate(
        flops=2 * m * n * kdim + 8 * m * n,
        transcendentals=m,
        bytes_accessed=int(m * kdim * 2 + kdim * n * 2 + 2 * m * n * 2 + 3 * n * 4),
    )
    return pl.pallas_call(
        _matmul_res_ln_kernel,
        grid=grid,
        in_specs=[
            pl.BlockSpec((tm, tk), lambda i, k: (i, k)),
            pl.BlockSpec((tk, n), lambda i, k: (k, 0)),
            pl.BlockSpec((1, n), lambda i, k: (0, 0)),
            pl.BlockSpec((tm, n), lambda i, k: (i, 0)),
            pl.BlockSpec((1, n), lambda i, k: (0, 0)),
            pl.BlockSpec((1, n), lambda i, k: (0, 0)),
        ],
        out_specs=pl.BlockSpec((tm, n), lambda i, k: (i, 0)),
        out_shape=jax.ShapeDtypeStruct((m, n), out_dtype),
        scratch_shapes=[pltpu.VMEM((tm, n), jnp.float32)],
        compiler_params=pltpu.CompilerParams(
            dimension_semantics=("parallel", "arbitrary"),
            vmem_limit_bytes=_vmem_limit()),
        cost_estimate=cost,
    )(x, w, b, res, gamma, beta)


# ---------------------------------------------------------------------------
# Plain LayerNorm (embedding LN)
# ---------------------------------------------------------------------------
def _layernorm_kernel(x_ref, g_ref, b_ref, o_ref):
    z = x_ref[...].astype(jnp.float32)
    mu = jnp.mean(z, axis=-1, keepdims=True)
    var = jnp.mean((z - mu) ** 2, axis=-1, keepdims=True)
    z = (z - mu) * jax.lax.rsqrt(var + 1e-12)
    o_ref[...] = (z * g_ref[...] + b_ref[...]).astype(o_ref.dtype)


def layernorm(x, gamma, beta, out_dtype=jnp.bfloat16):
    m, h = x.shape
    tm = _pick(m, 512)
    return pl.pallas_call(
        _layernorm_kernel,
        grid=(m // tm,),
        in_specs=[pl.BlockSpec((tm, h), lambda i: (i, 0)),
                  pl.BlockSpec((1, h), lambda i: (0, 0)),
                  pl.BlockSpec((1, h), lambda i: (0, 0))],
        out_specs=pl.BlockSpec((tm, h), lambda i: (i, 0)),
        out_shape=jax.ShapeDtypeStruct((m, h), out_dtype),
        compiler_params=pltpu.CompilerParams(
            dimension_semantics=("parallel",),
            vmem_limit_bytes=_vmem_limit()),
    )(x, gamma, beta)


# ---------------------------------------------------------------------------
# Flash attention straight from the fused (B, S, 3H) QKV slab.
#   grid = (batch, q-blocks, kv-blocks); Q/K/V are column blocks of the same
#   array (lane-dense, H multiple of 128); heads are looped in-kernel and the
#   merged (tq, H) context is written in one lane-dense store.
#   1/sqrt(Dh) is pre-folded into the Q projection weights.
# ---------------------------------------------------------------------------
def _flash_attention_kernel(q_ref, k_ref, v_ref, mask_ref, o_ref,
                            m_sc, l_sc, acc_sc, *, num_heads, head_dim):
    kv = pl.program_id(2)

    @pl.when(kv == 0)
    def _():
        m_sc[...] = jnp.full_like(m_sc, -1e30)
        l_sc[...] = jnp.zeros_like(l_sc)
        acc_sc[...] = jnp.zeros_like(acc_sc)

    q = q_ref[0]           # (tq, H)   bf16, Q columns (scale folded into wqkv)
    k = k_ref[0]           # (tkv, H)  bf16, K columns
    v = v_ref[0]           # (tkv, H)  bf16, V columns
    mask = mask_ref[0]     # (1, tkv)  f32 additive mask

    # TODO(synk): a per-layer pre-transposed K (Dh, S) slab would avoid the
    # implicit transpose of the K tile in each head's q @ k^T below.
    for h in range(num_heads):
        cols = slice(h * head_dim, (h + 1) * head_dim)
        s = jax.lax.dot_general(q[:, cols], k[:, cols],
                                (((1,), (1,)), ((), ())),
                                preferred_element_type=jnp.float32)
        s = s + mask                                           # (tq, tkv)
        m_prev = m_sc[:, h:h + 1]
        m_new = jnp.maximum(m_prev, jnp.max(s, axis=-1, keepdims=True))
        alpha = jnp.exp(m_prev - m_new)
        p = jnp.exp(s - m_new)
        l_sc[:, h:h + 1] = (alpha * l_sc[:, h:h + 1]
                            + jnp.sum(p, axis=-1, keepdims=True))
        acc_sc[:, cols] = alpha * acc_sc[:, cols] + jnp.dot(
            p.astype(v.dtype), v[:, cols], preferred_element_type=jnp.float32)
        m_sc[:, h:h + 1] = m_new

    @pl.when(kv == pl.num_programs(2) - 1)
    def _():
        parts = []
        for h in range(num_heads):
            cols = slice(h * head_dim, (h + 1) * head_dim)
            inv_l = pl.reciprocal(l_sc[:, h:h + 1], approx=True)
            parts.append(acc_sc[:, cols] * inv_l)
        o_ref[0] = jnp.concatenate(parts, axis=-1).astype(o_ref.dtype)   # lane-dense


def flash_attention(qkv, mask_add, num_heads):
    """qkv: (B, S, 3H) bf16 (Q|K|V column blocks); mask_add: (B,1,S) f32.
    Returns merged context (B, S, H) bf16.  Requires H % 128 == 0."""
    b, s, three_h = qkv.shape
    h = three_h // 3
    dh = h // num_heads
    assert h % 128 == 0, "hidden size must be lane-dense (multiple of 128)"
    tq = _pick(s, 256)
    tkv = _pick(s, 512)
    grid = (b, s // tq, s // tkv)
    return pl.pallas_call(
        functools.partial(_flash_attention_kernel,
                          num_heads=num_heads, head_dim=dh),
        grid=grid,
        in_specs=[
            pl.BlockSpec((1, tq, h), lambda bi, qi, kv: (bi, qi, 0)),   # Q cols
            pl.BlockSpec((1, tkv, h), lambda bi, qi, kv: (bi, kv, 1)),  # K cols
            pl.BlockSpec((1, tkv, h), lambda bi, qi, kv: (bi, kv, 2)),  # V cols
            pl.BlockSpec((1, 1, tkv), lambda bi, qi, kv: (bi, 0, kv)),
        ],
        out_specs=pl.BlockSpec((1, tq, h), lambda bi, qi, kv: (bi, qi, 0)),
        out_shape=jax.ShapeDtypeStruct((b, s, h), jnp.bfloat16),
        scratch_shapes=[pltpu.VMEM((tq, num_heads), jnp.float32),
                        pltpu.VMEM((tq, num_heads), jnp.float32),
                        pltpu.VMEM((tq, h), jnp.float32)],
        compiler_params=pltpu.CompilerParams(
            dimension_semantics=("parallel", "parallel", "arbitrary"),
            vmem_limit_bytes=_vmem_limit()),
    )(qkv, qkv, qkv, mask_add)


# ---------------------------------------------------------------------------
# Fused pooler + classifier: logits = tanh(cls@Wp+bp) @ Wfc + bfc
# ---------------------------------------------------------------------------
def _pooler_fc_kernel(cls_ref, wp_ref, bp_ref, wfc_ref, bfc_ref, o_ref):
    pooled = jnp.tanh(
        jnp.dot(cls_ref[...], wp_ref[...], preferred_element_type=jnp.float32)
        + bp_ref[...])
    # dropout(p=0.1): identity at inference; classifier matmul kept in f32
    logits = jnp.dot(pooled, wfc_ref[...],
                     preferred_element_type=jnp.float32) + bfc_ref[...]
    o_ref[...] = logits.astype(o_ref.dtype)


def pooler_classifier(cls, wp, bp, wfc, bfc):
    b, h = cls.shape
    _, c = wfc.shape
    return pl.pallas_call(
        _pooler_fc_kernel,
        grid=(1,),
        in_specs=[_full_spec((b, h)), _full_spec((h, h)), _full_spec((1, h)),
                  _full_spec((h, c)), _full_spec((1, c))],
        out_specs=_full_spec((b, c)),
        out_shape=jax.ShapeDtypeStruct((b, c), jnp.float32),
    )(cls, wp, bp, wfc, bfc)


# ---------------------------------------------------------------------------
# Deterministic parameter init (synthetic "bert-base-uncased"-shaped mini model)
# ---------------------------------------------------------------------------
def init_params(key, *, vocab=100, max_pos=32, type_vocab=2, hidden=256,
                num_heads=2, intermediate=512, num_layers=2, num_classes=3):
    def nrm(k, shape, dtype=jnp.float32, scale=0.02):
        return (scale * jax.random.normal(k, shape, dtype=jnp.float32)).astype(dtype)

    keys = iter(jax.random.split(key, 8 + num_layers * 8))
    bf16 = jnp.bfloat16
    dh = hidden // num_heads
    q_scale = 1.0 / math.sqrt(dh)
    p = {
        "num_heads": num_heads,
        "word_emb": nrm(next(keys), (vocab, hidden)),
        "pos_emb": nrm(next(keys), (max_pos, hidden)),
        "type_emb": nrm(next(keys), (type_vocab, hidden)),
        "emb_ln_g": jnp.ones((1, hidden), jnp.float32),
        "emb_ln_b": jnp.zeros((1, hidden), jnp.float32),
        "wp": nrm(next(keys), (hidden, hidden), bf16),
        "bp": jnp.zeros((1, hidden), jnp.float32),
        "wfc": nrm(next(keys), (hidden, num_classes), jnp.float32),  # f32 classifier
        "bfc": jnp.zeros((1, num_classes), jnp.float32),
        "layers": [],
    }
    for _ in range(num_layers):
        wqkv = 0.02 * jax.random.normal(next(keys), (hidden, 3 * hidden),
                                        dtype=jnp.float32)
        # Fold the 1/sqrt(Dh) attention scale into the Q projection (free at runtime).
        wqkv = wqkv.at[:, :hidden].multiply(q_scale)
        layer = {
            "wqkv": wqkv.astype(bf16),                       # (H, 3H) = [Q | K | V]
            "bqkv": jnp.zeros((1, 3 * hidden), jnp.float32),  # Q slice scale-folded too
            "wo": nrm(next(keys), (hidden, hidden), bf16),
            "bo": jnp.zeros((1, hidden), jnp.float32),
            "ln1_g": jnp.ones((1, hidden), jnp.float32),
            "ln1_b": jnp.zeros((1, hidden), jnp.float32),
            "w1": nrm(next(keys), (hidden, intermediate), bf16),
            "b1": jnp.zeros((1, intermediate), jnp.float32),
            "w2": nrm(next(keys), (intermediate, hidden), bf16),
            "b2": jnp.zeros((1, hidden), jnp.float32),
            "ln2_g": jnp.ones((1, hidden), jnp.float32),
            "ln2_b": jnp.zeros((1, hidden), jnp.float32),
        }
        p["layers"].append(layer)
    return p


# ---------------------------------------------------------------------------
# Forward pass: BERT encoder -> pooler -> dropout(identity) -> fc
# ---------------------------------------------------------------------------
def bert_classifier_forward(params, input_ids, attention_mask):
    B, S = input_ids.shape
    H = params["word_emb"].shape[1]
    nH = params["num_heads"]

    # --- embeddings (gather is plain-JAX glue) ---
    x = (params["word_emb"][input_ids]
         + params["pos_emb"][:S][None, :, :]
         + params["type_emb"][0][None, None, :]).astype(jnp.float32)   # (B, S, H)
    x = layernorm(x.reshape(B * S, H), params["emb_ln_g"], params["emb_ln_b"])

    # additive attention mask: 0 where attended, -1e4 where padded (f32)
    mask_add = ((1.0 - attention_mask.astype(jnp.float32)) * -10000.0
                ).reshape(B, 1, S)

    # --- transformer layers (no XLA transposes: only free reshapes) ---
    for layer in params["layers"]:
        qkv = linear(x, layer["wqkv"], layer["bqkv"])          # (B*S, 3H) bf16
        ctx = flash_attention(qkv.reshape(B, S, 3 * H), mask_add, nH)   # (B, S, H)
        x = linear_residual_layernorm(ctx.reshape(B * S, H), layer["wo"],
                                      layer["bo"], x,
                                      layer["ln1_g"], layer["ln1_b"])
        h1 = linear(x, layer["w1"], layer["b1"], activation="gelu")
        x = linear_residual_layernorm(h1, layer["w2"], layer["b2"],
                                      x, layer["ln2_g"], layer["ln2_b"])

    # --- pooler + dropout(identity) + classifier, fused in one kernel ---
    cls = x.reshape(B, S, H)[:, 0, :]                          # (B, H) bf16
    logits = pooler_classifier(cls, params["wp"], params["bp"],
                               params["wfc"], params["bfc"])   # (B, num_classes)
    return logits


if __name__ == "__main__":
    key = jax.random.PRNGKey(0)
    params = init_params(key)

    B, S = 2, 16
    k_ids, _ = jax.random.split(key)
    input_ids = jax.random.randint(k_ids, (B, S), 0, 100, dtype=jnp.int32)
    attention_mask = jnp.ones((B, S), dtype=jnp.int32)
    attention_mask = attention_mask.at[1, 12:].set(0)          # pad tail of seq 1

    logits = bert_classifier_forward(params, input_ids, attention_mask)
    jax.block_until_ready(logits)
    assert logits.shape == (B, 3) and logits.dtype == jnp.float32
    print("KERNEL_OK")
</pallas_src>

<mosaic_0001>
module attributes {stable_mosaic.version = 11 : i64} {
  func.func @_layernorm_kernel(%arg0: i32, %arg1: memref<32x256xf32, #tpu.memory_space<vmem>>, %arg2: memref<1x256xf32, #tpu.memory_space<vmem>>, %arg3: memref<1x256xf32, #tpu.memory_space<vmem>>, %arg4: memref<32x256xbf16, #tpu.memory_space<vmem>>) attributes {dimension_semantics = [#tpu.dimension_semantics<parallel>], iteration_bounds = array<i64: 1>, scalar_prefetch = 0 : i64, scratch_operands = 0 : i64, tpu.core_type = #tpu.core_type<tc>, window_params = [{transform_indices = @transform_0, window_bounds = array<i64: 32, 256>}, {pipeline_mode = #tpu.pipeline_mode<synchronous>, transform_indices = @transform_1, window_bounds = array<i64: 1, 256>}, {pipeline_mode = #tpu.pipeline_mode<synchronous>, transform_indices = @transform_2, window_bounds = array<i64: 1, 256>}, {transform_indices = @transform_3, window_bounds = array<i64: 32, 256>}]} {
    %c0 = arith.constant 0 : index
    %c0_0 = arith.constant 0 : index
    %0 = vector.load %arg1[%c0, %c0_0] : memref<32x256xf32, #tpu.memory_space<vmem>>, vector<32x256xf32>
    %cst = arith.constant dense<0.000000e+00> : vector<32xf32>
    %1 = vector.multi_reduction <add>, %0, %cst [1] : vector<32x256xf32> to vector<32xf32>
    %2 = vector.shape_cast %1 : vector<32xf32> to vector<32x1xf32>
    %cst_1 = arith.constant 2.560000e+02 : f32
    %3 = vector.broadcast %cst_1 : f32 to vector<32x1xf32>
    %4 = arith.divf %2, %3 : vector<32x1xf32>
    %5 = vector.broadcast %4 : vector<32x1xf32> to vector<32x256xf32>
    %6 = arith.subf %0, %5 : vector<32x256xf32>
    %7 = arith.mulf %6, %6 : vector<32x256xf32>
    %cst_2 = arith.constant dense<0.000000e+00> : vector<32xf32>
    %8 = vector.multi_reduction <add>, %7, %cst_2 [1] : vector<32x256xf32> to vector<32xf32>
    %9 = vector.shape_cast %8 : vector<32xf32> to vector<32x1xf32>
    %cst_3 = arith.constant 2.560000e+02 : f32
    %10 = vector.broadcast %cst_3 : f32 to vector<32x1xf32>
    %11 = arith.divf %9, %10 : vector<32x1xf32>
    %12 = vector.broadcast %4 : vector<32x1xf32> to vector<32x256xf32>
    %13 = arith.subf %0, %12 : vector<32x256xf32>
    %cst_4 = arith.constant 9.99999996E-13 : f32
    %14 = vector.broadcast %cst_4 : f32 to vector<32x1xf32>
    %15 = arith.addf %11, %14 : vector<32x1xf32>
    %16 = math.rsqrt %15 : vector<32x1xf32>
    %17 = vector.broadcast %16 : vector<32x1xf32> to vector<32x256xf32>
    %18 = arith.mulf %13, %17 : vector<32x256xf32>
    %c0_5 = arith.constant 0 : index
    %c0_6 = arith.constant 0 : index
    %19 = vector.load %arg2[%c0_5, %c0_6] : memref<1x256xf32, #tpu.memory_space<vmem>>, vector<1x256xf32>
    %20 = vector.broadcast %19 : vector<1x256xf32> to vector<32x256xf32>
    %21 = arith.mulf %18, %20 : vector<32x256xf32>
    %c0_7 = arith.constant 0 : index
    %c0_8 = arith.constant 0 : index
    %22 = vector.load %arg3[%c0_7, %c0_8] : memref<1x256xf32, #tpu.memory_space<vmem>>, vector<1x256xf32>
    %23 = vector.broadcast %22 : vector<1x256xf32> to vector<32x256xf32>
    %24 = arith.addf %21, %23 : vector<32x256xf32>
    %25 = arith.truncf %24 : vector<32x256xf32> to vector<32x256xbf16>
    %c0_9 = arith.constant 0 : index
    %c0_10 = arith.constant 0 : index
    %26 = vector.load %arg4[%c0_9, %c0_10] : memref<32x256xbf16, #tpu.memory_space<vmem>>, vector<32x256xbf16>
    tpu.vector_store %arg4[%c0_9, %c0_10], %25 {strides = array<i32>} : memref<32x256xbf16, #tpu.memory_space<vmem>>, vector<32x256xbf16>,
    return
  }
  func.func @transform_0(%arg0: i32) -> (i32, i32) {
    %c0_i32 = arith.constant 0 : i32
    %c0_i32_0 = arith.constant 0 : i32
    return %arg0, %c0_i32 : i32, i32
  }
  func.func @transform_1(%arg0: i32) -> (i32, i32) {
    %c0_i32 = arith.constant 0 : i32
    %c0_i32_0 = arith.constant 0 : i32
    %c0_i32_1 = arith.constant 0 : i32
    return %c0_i32, %c0_i32_0 : i32, i32
  }
  func.func @transform_2(%arg0: i32) -> (i32, i32) {
    %c0_i32 = arith.constant 0 : i32
    %c0_i32_0 = arith.constant 0 : i32
    %c0_i32_1 = arith.constant 0 : i32
    return %c0_i32, %c0_i32_0 : i32, i32
  }
  func.func @transform_3(%arg0: i32) -> (i32, i32) {
    %c0_i32 = arith.constant 0 : i32
    %c0_i32_0 = arith.constant 0 : i32
    return %arg0, %c0_i32 : i32, i32
  }
}

</mosaic_0001>

<bundles_post_ra>
// kernel: tpu_custom_call.1
= control target key start
LH: loop header
LB: loop body
LE: loop exit
PB: predicated region body
PF: predicated region fallthrough
CT: control target
= control target key end

     0   :  { %8 = vsyncpa [#allocation3], 0  ;;  %s431_s0 = inlined_call_operand.hbm [shape: f32[32,256], index: 0, kind: input, shape index: {}]   ;;  %s432_s1 = inlined_call_operand.hbm [shape: f32[1,256], index: 1, kind: input, shape index: {}]   ;;  %s433_s2 = inlined_call_operand.hbm [shape: f32[1,256], index: 2, kind: input, shape index: {}]   ;;  %s434_s3 = inlined_call_operand.hbm [shape: bf16[32,256], index: 3, kind: output, shape index: {}]  }
   0x1   :  { %9 = vsyncpa [#allocation6], 0  ;;  %s29_s14 = sshll.u32 %s432_s1, 4  ;;  %s30_s14 = int_to_ptr.hbm [resolvable:$true] %s29_s14 }
   0x2   :  { %10 = vsyncpa [#allocation4], 0  ;;  %s350_s15 = smov [#allocation5]   ;;  %s15_s19 = sshll.u32 %s431_s0, 4  ;;  %s16_s19 = int_to_ptr.hbm [resolvable:$true] %s15_s19 }
   0x3   :  { %s31_s16 = sshll.u32 %s350_s15, 4  ;;  %s351_s20 = smov [#allocation2]   ;;  %s32_s16 = int_to_ptr.vmem [resolvable:$true] %s31_s16 }
   0x4   :  { %34 = dma.hbm_to_vmem [thread:$0]  %s30_s14, 32, %s32_s16, [#allocation6]  }
   0x5   :  { %s17_s21 = sshll.u32 %s351_s20, 4  ;;  %s352_s22 = smov 256   ;;  %s18_s21 = int_to_ptr.vmem [resolvable:$true] %s17_s21 }
   0x6   :  { %s353_s23 = smov 16   ;;  %s40_s1 = sshll.u32 %s433_s2, 4  ;;  %s41_s1 = int_to_ptr.hbm [resolvable:$true] %s40_s1 }
   0x7   :  { %23 = dma.hbm_to_vmem [thread:$0]  %s16_s19, 1024, %s18_s21, [#allocation3], %s352_s22, %s352_s22, %s353_s23  }
   0x8   :  { %s354_s26 = smov [#allocation7]  }
   0x9   :  { %s42_s27 = sshll.u32 %s354_s26, 4  ;;  %s43_s27 = int_to_ptr.vmem [resolvable:$true] %s42_s27 }
   0xa   :  { %45 = dma.hbm_to_vmem [thread:$0]  %s41_s1, 32, %s43_s27, [#allocation6]  }
   0xb   :  { %344 = dma.done.wait [#allocation3], 1024  }
   0xc   :  { %345 = vsyncadd [#allocation3], 4294966272 }
   0xd   :  { %346 = dma.done.wait [#allocation6], 64  }
   0xe   :  { %347 = vsyncadd [#allocation6], 4294967232  ;;  %v62_v0 = vld [vmem:[#allocation2 + $0x20] sm:$0xff]  ;;  %v63_v1 = vld [vmem:[#allocation2 + $0x28] sm:$0xff]  ;;  %v355_v12 = vmov 256.0   ;;  %s356_s0 = smov [#allocation8]  }
   0xf   :  { %v58_v2 = vld [vmem:[#allocation2] sm:$0xff]  ;;  %v72_v3 = vadd.f32 %v63_v1, %v62_v0  ;;  %v59_v4 = vld [vmem:[#allocation2 + $0x8] sm:$0xff]  ;;  %v64_v6 = vld [vmem:[#allocation2 + $0x30] sm:$0xff]  ;;  %238 = vrcp.f32 %v355_v12  ;;  %s213_s2 = sshll.u32 %s356_s0, 4  ;;  %s215_s30 = sshll.u32 %s434_s3, 4  ;;  %s214_s2 = int_to_ptr.vmem [resolvable:$true] %s213_s2  ;;  %s216_s30 = int_to_ptr.hbm [resolvable:$true] %s215_s30 }
  0x10   :  { %v66_v5 = vadd.f32 %v59_v4, %v58_v2  ;;  %v65_v7 = vld [vmem:[#allocation2 + $0x38] sm:$0xff]  ;;  %v60_v8 = vld [vmem:[#allocation2 + $0x10] sm:$0xff]  ;;  %s357_s4 = smov 128   ;;  %s358_s5 = smov 8  }
  0x11   :  { %73 = vadd.xlane.f32.xlu1 %v72_v3  ;;  %v61_v9 = vld [vmem:[#allocation2 + $0x18] sm:$0xff]  ;;  %v75_v10 = vadd.f32 %v65_v7, %v64_v6 }
  0x12   :  { %67 = vadd.xlane.f32.xlu0 %v66_v5  ;;  %v69_v11 = vadd.f32 %v61_v9, %v60_v8 }
  0x15   :  { %v239_v13 = vpop.eup %238 }
  0x16   :  { %v79_v14 = vmul.f32 256.0, %v239_v13  ;;  %vm83_vm0 = vweird.f32 %v239_v13 }
  0x18   :  { %v80_v15 = vsub.f32 1.0, %v79_v14 }
  0x19   :  { %76 = vadd.xlane.f32.xlu1 %v75_v10 }
  0x1a   :  { %70 = vadd.xlane.f32.xlu0 %v69_v11  ;;  %v81_v16 = vmul.f32 %v239_v13, %v80_v15 }
  0x1c   :  { %v82_v17 = vadd.f32 %v239_v13, %v81_v16 }
  0x1e   :  { %v84_v18 = vsel %vm83_vm0, %v239_v13, %v82_v17 }
  0x84   :  { %v74_v19 = vpop.xlane.xlu1 %73 }
  0x85   :  { %v87_v20 = vmul.f32 %v84_v18, %v74_v19  ;;  %v68_v21 = vpop.xlane.xlu0 %67 }
  0x86   :  { %v85_v22 = vmul.f32 %v84_v18, %v68_v21 }
  0x87   :  { %v388_v23 = vsub.f32 %v62_v0, %v87_v20  ;;  %v390_v24 = vsub.f32 %v63_v1, %v87_v20 }
  0x88   :  { %v392_v25 = vsub.f32 %v58_v2, %v85_v22  ;;  %v394_v26 = vsub.f32 %v59_v4, %v85_v22  ;;  %v173_v2 = vld [vmem:[#allocation5] sm:$0x3] }
  0x89   :  { %v101_v27 = vmul.f32 %v388_v23, %v388_v23  ;;  %v102_v28 = vmul.f32 %v390_v24, %v390_v24  ;;  %v176_v12 = vperm.slane %v173_v2, 1 }
  0x8a   :  { %v97_v29 = vmul.f32 %v392_v25, %v392_v25  ;;  %v98_v30 = vmul.f32 %v394_v26, %v394_v26 }
  0x8b   :  { %v111_v31 = vadd.f32 %v102_v28, %v101_v27 }
  0x8c   :  { %v77_v32 = vpop.xlane.xlu1 %76  ;;  %v105_v33 = vadd.f32 %v98_v30, %v97_v29 }
  0x8d   :  { %v88_v34 = vmul.f32 %v84_v18, %v77_v32  ;;  %v71_v35 = vpop.xlane.xlu0 %70  ;;  %112 = vadd.xlane.f32.xlu0 %v111_v31 }
  0x8e   :  { %v86_v36 = vmul.f32 %v84_v18, %v71_v35  ;;  %106 = vadd.xlane.f32.xlu2 %v105_v33 }
  0x8f   :  { %v404_v37 = vsub.f32 %v64_v6, %v88_v34  ;;  %v406_v38 = vsub.f32 %v65_v7, %v88_v34  ;;  %v187_v6 = vld [vmem:[#allocation7] sm:$0x3] }
  0x90   :  { %v408_v39 = vsub.f32 %v60_v8, %v86_v36  ;;  %v410_v40 = vsub.f32 %v61_v9, %v86_v36  ;;  %v175_v9 = vperm.slane %v173_v2, 0  ;;  %v189_v15 = vperm.slane %v187_v6, 0 }
  0x91   :  { %v103_v41 = vmul.f32 %v404_v37, %v404_v37  ;;  %v104_v42 = vmul.f32 %v406_v38, %v406_v38  ;;  %v190_v16 = vperm.slane %v187_v6, 1 }
  0x92   :  { %v99_v43 = vmul.f32 %v408_v39, %v408_v39  ;;  %v100_v44 = vmul.f32 %v410_v40, %v410_v40 }
  0x93   :  { %v114_v45 = vadd.f32 %v104_v42, %v103_v41 }
  0x94   :  { %v108_v46 = vadd.f32 %v100_v44, %v99_v43 }
  0x95   :  { %115 = vadd.xlane.f32.xlu1 %v114_v45 }
  0x96   :  { %109 = vadd.xlane.f32.xlu2 %v108_v46 }
 0x100   :  { %v113_v47 = vpop.xlane.xlu0 %112 }
 0x101   :  { %v107_v48 = vpop.xlane.xlu2 %106  ;;  %v119_v49 = vmul.f32 %v113_v47, %v84_v18 }
 0x102   :  { %v117_v50 = vmul.f32 %v107_v48, %v84_v18 }
 0x103   :  { %v123_v51 = vadd.f32 1e-12, %v119_v49 }
 0x104   :  { %v121_v52 = vadd.f32 1e-12, %v117_v50 }
 0x105   :  { %240 = vrsqrt.f32 %v123_v51  ;;  %vm151_vm3 = vweird.f32 %v123_v51 }
 0x106   :  { %242 = vrsqrt.f32 %v121_v52  ;;  %vm131_vm4 = vweird.f32 %v121_v52 }
 0x108   :  { %v116_v53 = vpop.xlane.xlu1 %115 }
 0x109   :  { %v120_v54 = vmul.f32 %v116_v53, %v84_v18  ;;  %v110_v55 = vpop.xlane.xlu2 %109 }
 0x10a   :  { %v118_v56 = vmul.f32 %v110_v55, %v84_v18 }
 0x10b   :  { %v241_v57 = vpop.eup %240  ;;  %v124_v58 = vadd.f32 1e-12, %v120_v54 }
 0x10c   :  { %v243_v59 = vpop.eup %242  ;;  %v146_v60 = vmul.f32 %v241_v57, %v123_v51  ;;  %v122_v61 = vadd.f32 1e-12, %v118_v56  ;;  %vm152_vm1 = vweird.f32 %v241_v57 }
 0x10d   :  { %v126_v62 = vmul.f32 %v243_v59, %v121_v52  ;;  %244 = vrsqrt.f32 %v124_v58  ;;  %vm132_vm2 = vweird.f32 %v243_v59  ;;  %vm153_vm5 = vmor %vm151_vm3, %vm152_vm1  ;;  %vm161_vm9 = vweird.f32 %v124_v58 }
 0x10e   :  { %v147_v63 = vmul.f32 %v241_v57, %v146_v60  ;;  %246 = vrsqrt.f32 %v122_v61  ;;  %vm133_vm6 = vmor %vm131_vm4, %vm132_vm2  ;;  %vm141_vm11 = vweird.f32 %v122_v61 }
 0x10f   :  { %v127_v0 = vmul.f32 %v243_v59, %v126_v62 }
 0x110   :  { %v148_v1 = vmul.f32 0.5, %v147_v63 }
 0x111   :  { %v128_v3 = vmul.f32 0.5, %v127_v0 }
 0x112   :  { %v149_v4 = vsub.f32 1.5, %v148_v1 }
 0x113   :  { %v245_v5 = vpop.eup %244  ;;  %v129_v7 = vsub.f32 1.5, %v128_v3 }
 0x114   :  { %v247_v8 = vpop.eup %246  ;;  %v150_v10 = vmul.f32 %v241_v57, %v149_v4  ;;  %v156_v11 = vmul.f32 %v245_v5, %v124_v58  ;;  %vm162_vm7 = vweird.f32 %v245_v5 }
 0x115   :  { %v130_v13 = vmul.f32 %v243_v59, %v129_v7  ;;  %v136_v14 = vmul.f32 %v247_v8, %v122_v61  ;;  %vm142_vm8 = vweird.f32 %v247_v8  ;;  %vm163_vm10 = vmor %vm161_vm9, %vm162_vm7 }
 0x116   :  { %v154_v17 = vsel %vm153_vm5, %v241_v57, %v150_v10  ;;  %v157_v18 = vmul.f32 %v245_v5, %v156_v11  ;;  %vm143_vm12 = vmor %vm141_vm11, %vm142_vm8 }
 0x117   :  { %v134_v19 = vsel %vm133_vm6, %v243_v59, %v130_v13  ;;  %v169_v20 = vmul.f32 %v154_v17, %v388_v23  ;;  %v170_v21 = vmul.f32 %v154_v17, %v390_v24  ;;  %v137_v22 = vmul.f32 %v247_v8, %v136_v14 }
 0x118   :  { %v165_v27 = vmul.f32 %v134_v19, %v392_v25  ;;  %v166_v28 = vmul.f32 %v134_v19, %v394_v26  ;;  %v158_v29 = vmul.f32 0.5, %v157_v18 }
 0x119   :  { %v183_v30 = vmul.f32 %v175_v9, %v169_v20  ;;  %v184_v31 = vmul.f32 %v176_v12, %v170_v21  ;;  %v138_v32 = vmul.f32 0.5, %v137_v22 }
 0x11a   :  { %v179_v33 = vmul.f32 %v175_v9, %v165_v27  ;;  %v180_v34 = vmul.f32 %v176_v12, %v166_v28  ;;  %v159_v35 = vsub.f32 1.5, %v158_v29 }
 0x11b   :  { %v197_v36 = vadd.f32 %v189_v15, %v183_v30  ;;  %v198_v41 = vadd.f32 %v190_v16, %v184_v31  ;;  %v139_v42 = vsub.f32 1.5, %v138_v32 }
 0x11c   :  { %v193_v23 = vadd.f32 %v189_v15, %v179_v33  ;;  %v194_v43 = vadd.f32 %v190_v16, %v180_v34  ;;  %v160_v24 = vmul.f32 %v245_v5, %v159_v35 }
 0x11d   :  { %v203_v44 = vpack.c.bf16 %v198_v41, %v197_v36  ;;  %v140_v25 = vmul.f32 %v247_v8, %v139_v42 }
 0x11e   :  { %v201_v26 = vpack.c.bf16 %v194_v43, %v193_v23  ;;  %v164_v45 = vsel %vm163_vm10, %v245_v5, %v160_v24 }
 0x11f   :  { %207 = vst [vmem:[#allocation8 + $0x10] sm:$0xff] %v203_v44  ;;  %v171_v46 = vmul.f32 %v164_v45, %v404_v37  ;;  %v172_v47 = vmul.f32 %v164_v45, %v406_v38  ;;  %v144_v48 = vsel %vm143_vm12, %v247_v8, %v140_v25 }
 0x120   :  { %205 = vst [vmem:[#allocation8] sm:$0xff] %v201_v26  ;;  %v167_v49 = vmul.f32 %v144_v48, %v408_v39  ;;  %v168_v50 = vmul.f32 %v144_v48, %v410_v40 }
 0x121   :  { %v185_v51 = vmul.f32 %v175_v9, %v171_v46  ;;  %v186_v52 = vmul.f32 %v176_v12, %v172_v47 }
 0x122   :  { %v181_v53 = vmul.f32 %v175_v9, %v167_v49  ;;  %v182_v54 = vmul.f32 %v176_v12, %v168_v50 }
 0x123   :  { %v199_v55 = vadd.f32 %v189_v15, %v185_v51  ;;  %v200_v37 = vadd.f32 %v190_v16, %v186_v52 }
 0x124   :  { %v195_v56 = vadd.f32 %v189_v15, %v181_v53  ;;  %v196_v38 = vadd.f32 %v190_v16, %v182_v54 }
 0x125   :  { %v204_v57 = vpack.c.bf16 %v200_v37, %v199_v55 }
 0x126   :  { %v202_v39 = vpack.c.bf16 %v196_v38, %v195_v56 }
 0x127   :  { %208 = vst [vmem:[#allocation8 + $0x18] sm:$0xff] %v204_v57 }
 0x128   :  { %206 = vst [vmem:[#allocation8 + $0x8] sm:$0xff] %v202_v39 }
 0x129   :  { %221 = dma.vmem_to_hbm [thread:$0]  %s214_s2, 512, %s216_s30, [#allocation4], %s357_s4, %s357_s4, %s358_s5  }
 0x12a   :  { %348 = dma.done.wait [#allocation4], 512  }
 0x12b   :  { %349 = vsyncadd [#allocation4], 4294966784 }
 0x12c   :  { %226 = vsyncpa [#allocation3], 1 }
 0x12d   :  { %227 = vsyncpa [#allocation6], 1 }
 0x12e   :  { %228 = vsyncpa [#allocation4], 1 }

</bundles_post_ra>
